<compile_context>
chip_gen: v5e
topology: v5e:2x2
jax: 0.10.0
libtpu: 0.0.40
codegen_flags: <defaults>
</compile_context>

<pallas_src>
import functools

import jax
import jax.numpy as jnp
from jax import lax
from jax.experimental import pallas as pl
from jax.experimental.pallas import tpu as pltpu


def _round_up(x: int, m: int) -> int:
    return ((x + m - 1) // m) * m


def _vmem_capacity_bytes() -> int:
    """VMEM capacity of the current TPU generation (v7x: 64 MiB, v5e/v6e: 128 MiB)."""
    try:
        return int(pltpu.get_tpu_info().vmem_capacity_bytes)
    except Exception:
        return 64 * 1024 * 1024  # conservative fallback: smallest (v7x) VMEM


def _pick_tile_n(n: int, max_rows_by_budget: int) -> int:
    """Row-tile size for the single-feature-block path."""
    if n <= 8:
        return n                       # full-extent sublane block (no padding)
    t = (max(max_rows_by_budget, 8) // 8) * 8
    t = min(t, _round_up(n, 8), 256)
    # Keep >= 2 row blocks so both v7x TensorCores stream from HBM.
    t = min(t, _round_up((n + 1) // 2, 8))
    return max(t, 8)


# --------------------------------------------------------------------------- #
# Kernels
# --------------------------------------------------------------------------- #

def _mse_single_kernel(ref_ref, gen_ref, out_ref, *, inv_d: float):
    """Whole feature axis in one block: one pass, no accumulator."""
    r = ref_ref[...].astype(jnp.float32)
    g = gen_ref[...].astype(jnp.float32)
    diff = r - g
    out_ref[...] = jnp.sum(diff * diff, axis=-1, keepdims=True) * inv_d


def _mse_tiled_kernel(ref_ref, gen_ref, out_ref, acc_ref, *,
                      inv_d: float, d: int, tile_d: int):
    """Feature axis tiled (k = last grid axis); lane-dense f32 accumulator."""
    k = pl.program_id(1)
    nk = pl.num_programs(1)

    @pl.when(k == 0)
    def _():
        acc_ref[...] = jnp.zeros_like(acc_ref)

    r = ref_ref[...].astype(jnp.float32)
    g = gen_ref[...].astype(jnp.float32)
    diff = r - g
    d2 = diff * diff

    def lane_fold(x):
        # Pairwise fold over 128-wide lane groups: lane-aligned slices, pure VALU
        # adds, log2(tile_d/128) traced ops. No cross-lane XLU work per step.
        while x.shape[-1] > 128:
            half = x.shape[-1] // 2
            x = x[:, :half] + x[:, half:]
        return x

    def accumulate(vals):
        acc_ref[...] += lane_fold(vals)

    if d % tile_d != 0:
        # Only the boundary feature tile contains stale (clipped-DMA) columns.
        @pl.when(k == nk - 1)
        def _():
            col = lax.broadcasted_iota(jnp.int32, d2.shape, 1) + k * tile_d
            accumulate(jnp.where(col < d, d2, 0.0))

        @pl.when(k != nk - 1)
        def _():
            accumulate(d2)
    else:
        accumulate(d2)

    # Single finalize: one cross-lane reduce + scale per row tile.
    @pl.when(k == nk - 1)
    def _():
        out_ref[...] = jnp.sum(acc_ref[...], axis=-1, keepdims=True) * inv_d


# --------------------------------------------------------------------------- #
# Wrapper
# --------------------------------------------------------------------------- #

def mse_pallas(reference_observations: jax.Array,
               generated_observations: jax.Array,
               *,
               block_f32_bytes: int | None = None) -> jax.Array:
    """
    reference_observations / generated_observations:
        (bs, observations_count, cameras_count, channels, height, width)
    returns: (bs, observations_count) float32 MSE per observation.

    block_f32_bytes: optional override of the per-block f32-equivalent VMEM budget
    (mainly for testing the tiled-reduction path on small inputs).
    """
    bs, obs, cameras, c, h, w = reference_observations.shape
    if cameras != 1:
        raise Exception(
            f"Expected 1 cameras, but the observations have {cameras} cameras")

    n = bs * obs
    d = c * h * w

    # Squeeze camera axis + flatten (C,H,W): metadata-only, no HBM copy, dtype kept.
    ref2d = reference_observations[:, :, 0].reshape(n, d)
    gen2d = generated_observations[:, :, 0].reshape(n, d)

    # ---- generation-aware per-block budget (f32-equivalent bytes) ---------- #
    vmem_cap = _vmem_capacity_bytes()
    if block_f32_bytes is None:
        # ~(4 input buffers + f32 temporaries) * block must stay well inside VMEM.
        block_f32_bytes = min(vmem_cap // 14, 8 << 20)
    block_f32_bytes = max(int(block_f32_bytes), 64 << 10)

    tile_n_min = n if n < 8 else 8
    inv_d = 1.0 / float(d)
    out_shape = jax.ShapeDtypeStruct((n, 1), jnp.float32)

    if tile_n_min * d * 4 <= block_f32_bytes:
        # ---- single feature block per row tile: no k axis, no accumulator ---- #
        tile_n = _pick_tile_n(n, block_f32_bytes // (d * 4))
        tile_d = d  # full-extent lane dim (no 128-padding required)
        grid = (pl.cdiv(n, tile_n),)
        kernel = functools.partial(_mse_single_kernel, inv_d=inv_d)
        in_specs = [pl.BlockSpec((tile_n, d), lambda i: (i, 0)),
                    pl.BlockSpec((tile_n, d), lambda i: (i, 0))]
        out_specs = pl.BlockSpec((tile_n, 1), lambda i: (i, 0))
        scratch_shapes = []
        dimension_semantics = ("parallel",)
    else:
        # ---- tiled feature reduction: rows parallel, features arbitrary ------ #
        tile_n = tile_n_min
        groups = block_f32_bytes // (tile_n * 4 * 128)
        groups = max(1, 1 << (groups.bit_length() - 1))  # power of two -> clean fold
        tile_d = 128 * groups                            # < d by path construction
        grid = (pl.cdiv(n, tile_n), pl.cdiv(d, tile_d))
        kernel = functools.partial(_mse_tiled_kernel, inv_d=inv_d, d=d, tile_d=tile_d)
        in_specs = [pl.BlockSpec((tile_n, tile_d), lambda i, k: (i, k)),
                    pl.BlockSpec((tile_n, tile_d), lambda i, k: (i, k))]
        out_specs = pl.BlockSpec((tile_n, 1), lambda i, k: (i, 0))
        scratch_shapes = [pltpu.VMEM((tile_n, 128), jnp.float32)]
        dimension_semantics = ("parallel", "arbitrary")

    # ---- VMEM limit: double-buffered inputs + f32 compute temporaries ------ #
    tile_elems = tile_n * tile_d
    in_bytes_per_elem = ref2d.dtype.itemsize + gen2d.dtype.itemsize
    vmem_est = (2 * tile_elems * in_bytes_per_elem    # 2 buffers x (ref + gen) blocks
                + 3 * tile_elems * 4                  # f32 upcast / diff temporaries
                + (2 << 20))
    vmem_limit = int(max(vmem_est, 32 << 20))
    vmem_limit = int(min(vmem_limit, max(int(vmem_cap * 0.9), vmem_est)))

    cost = pl.CostEstimate(
        flops=3 * n * d,              # sub + mul + add per element
        transcendentals=0,
        bytes_accessed=n * d * in_bytes_per_elem + n * 4,
    )

    out = pl.pallas_call(
        kernel,
        out_shape=out_shape,
        grid_spec=pltpu.PrefetchScalarGridSpec(
            num_scalar_prefetch=0,
            grid=grid,
            in_specs=in_specs,
            out_specs=out_specs,
            scratch_shapes=scratch_shapes,
        ),
        compiler_params=pltpu.CompilerParams(
            dimension_semantics=dimension_semantics,
            vmem_limit_bytes=vmem_limit,
        ),
        cost_estimate=cost,
    )(ref2d, gen2d)

    return out[:, 0].reshape(bs, obs)


def mse_reference(reference_observations, generated_observations):
    # Pure-JAX reference for correctness checking.
    ref = reference_observations[:, :, 0].astype(jnp.float32)
    gen = generated_observations[:, :, 0].astype(jnp.float32)
    return jnp.mean((ref - gen) ** 2, axis=(2, 3, 4))


if __name__ == "__main__":
    key = jax.random.PRNGKey(0)
    k1, k2 = jax.random.split(key)

    # (bs=2, observations_count=3, cameras_count=1, channels=4, H=16, W=16)
    shape = (2, 3, 1, 4, 16, 16)
    reference_observations = jax.random.normal(k1, shape, dtype=jnp.float32)
    generated_observations = jax.random.normal(k2, shape, dtype=jnp.float32)

    result = mse_pallas(reference_observations, generated_observations)
    jax.block_until_ready(result)
    expected = mse_reference(reference_observations, generated_observations)
    assert result.shape == (2, 3)
    assert jnp.allclose(result, expected, rtol=1e-5, atol=1e-5)

    # Rows not a multiple of 8 and a non-128-multiple-friendly feature size;
    # default budget -> single-feature-block path, no padding anywhere.
    shape2 = (1, 5, 1, 3, 48, 64)   # n=5, d=9216
    r2 = jax.random.normal(k1, shape2, dtype=jnp.float32)
    g2 = jax.random.normal(k2, shape2, dtype=jnp.float32)
    res2 = mse_pallas(r2, g2)
    jax.block_until_ready(res2)
    exp2 = mse_reference(r2, g2)
    assert res2.shape == (1, 5)
    assert jnp.allclose(res2, exp2, rtol=1e-5, atol=1e-5)

    # Same data, tiny per-block budget -> forces the tiled-reduction path
    # (k axis, lane-dense accumulator, boundary-tile masking).
    res3 = mse_pallas(r2, g2, block_f32_bytes=128 * 1024)
    jax.block_until_ready(res3)
    assert jnp.allclose(res3, exp2, rtol=1e-5, atol=1e-5)

    # Narrow HBM dtype: bf16 inputs stream at half the bytes, f32 math in-kernel.
    rb = reference_observations.astype(jnp.bfloat16)
    gb = generated_observations.astype(jnp.bfloat16)
    res4 = mse_pallas(rb, gb)
    jax.block_until_ready(res4)
    exp4 = mse_reference(rb, gb)
    assert jnp.allclose(res4, exp4, rtol=1e-3, atol=1e-3)

    print("KERNEL_OK")
</pallas_src>

<mosaic_0001>
module attributes {stable_mosaic.version = 11 : i64} {
  func.func @_mse_single_kernel(%arg0: i32, %arg1: memref<6x1024xf32, #tpu.memory_space<vmem>>, %arg2: memref<6x1024xf32, #tpu.memory_space<vmem>>, %arg3: memref<6x1xf32, #tpu.memory_space<vmem>>) attributes {dimension_semantics = [#tpu.dimension_semantics<parallel>], iteration_bounds = array<i64: 1>, scalar_prefetch = 0 : i64, scratch_operands = 0 : i64, tpu.core_type = #tpu.core_type<tc>, window_params = [{transform_indices = @transform_0, window_bounds = array<i64: 6, 1024>}, {transform_indices = @transform_1, window_bounds = array<i64: 6, 1024>}, {transform_indices = @transform_2, window_bounds = array<i64: 6, 1>}]} {
    %c0 = arith.constant 0 : index
    %c0_0 = arith.constant 0 : index
    %0 = vector.load %arg1[%c0, %c0_0] : memref<6x1024xf32, #tpu.memory_space<vmem>>, vector<6x1024xf32>
    %c0_1 = arith.constant 0 : index
    %c0_2 = arith.constant 0 : index
    %1 = vector.load %arg2[%c0_1, %c0_2] : memref<6x1024xf32, #tpu.memory_space<vmem>>, vector<6x1024xf32>
    %2 = arith.subf %0, %1 : vector<6x1024xf32>
    %3 = arith.mulf %2, %2 : vector<6x1024xf32>
    %cst = arith.constant dense<0.000000e+00> : vector<6xf32>
    %4 = vector.multi_reduction <add>, %3, %cst [1] : vector<6x1024xf32> to vector<6xf32>
    %5 = vector.shape_cast %4 : vector<6xf32> to vector<6x1xf32>
    %cst_3 = arith.constant 9.765625E-4 : f32
    %6 = vector.broadcast %cst_3 : f32 to vector<6x1xf32>
    %7 = arith.mulf %5, %6 : vector<6x1xf32>
    %c0_4 = arith.constant 0 : index
    %c0_5 = arith.constant 0 : index
    %8 = vector.load %arg3[%c0_4, %c0_5] : memref<6x1xf32, #tpu.memory_space<vmem>>, vector<6x1xf32>
    tpu.vector_store %arg3[%c0_4, %c0_5], %7 {strides = array<i32>} : memref<6x1xf32, #tpu.memory_space<vmem>>, vector<6x1xf32>,
    return
  }
  func.func @transform_0(%arg0: i32) -> (i32, i32) {
    %c0_i32 = arith.constant 0 : i32
    %c0_i32_0 = arith.constant 0 : i32
    return %arg0, %c0_i32 : i32, i32
  }
  func.func @transform_1(%arg0: i32) -> (i32, i32) {
    %c0_i32 = arith.constant 0 : i32
    %c0_i32_0 = arith.constant 0 : i32
    return %arg0, %c0_i32 : i32, i32
  }
  func.func @transform_2(%arg0: i32) -> (i32, i32) {
    %c0_i32 = arith.constant 0 : i32
    %c0_i32_0 = arith.constant 0 : i32
    return %arg0, %c0_i32 : i32, i32
  }
}

</mosaic_0001>

<bundles_post_ra>
// kernel: tpu_custom_call.1
= control target key start
LH: loop header
LB: loop body
LE: loop exit
PB: predicated region body
PF: predicated region fallthrough
CT: control target
= control target key end

     0   :  { %7 = vsyncpa [#allocation3], 0  ;;  %s186_s0 = inlined_call_operand.hbm [shape: f32[6,1024], index: 0, kind: input, shape index: {}]   ;;  %s187_s1 = inlined_call_operand.hbm [shape: f32[6,1024], index: 1, kind: input, shape index: {}]   ;;  %s188_s2 = inlined_call_operand.vmem [shape: f32[6,1], index: 2, kind: output, shape index: {}]  }
   0x1   :  { %s14_s11 = sshll.u32 %s186_s0, 4  ;;  %s15_s11 = int_to_ptr.hbm [resolvable:$true] %s14_s11 }
   0x2   :  { %8 = vsyncpa [#allocation5], 0  ;;  %s152_s12 = smov [#allocation2]   ;;  %s25_s16 = sshll.u32 %s187_s1, 4  ;;  %s26_s16 = int_to_ptr.hbm [resolvable:$true] %s25_s16 }
   0x3   :  { %s16_s13 = sshll.u32 %s152_s12, 4  ;;  %s153_s17 = smov [#allocation4]   ;;  %s17_s13 = int_to_ptr.vmem [resolvable:$true] %s16_s13 }
   0x4   :  { %19 = dma.hbm_to_vmem [thread:$0]  %s15_s11, 1024, %s17_s13, [#allocation3]  }
   0x5   :  { %s27_s18 = sshll.u32 %s153_s17, 4  ;;  %s28_s18 = int_to_ptr.vmem [resolvable:$true] %s27_s18 }
   0x6   :  { %30 = dma.hbm_to_vmem [thread:$0]  %s26_s16, 1024, %s28_s18, [#allocation5]  }
   0x7   :  { %148 = dma.done.wait [#allocation3], 1024  }
   0x8   :  { %149 = vsyncadd [#allocation3], 4294966272 }
   0x9   :  { %150 = dma.done.wait [#allocation5], 1024  }
   0xa   :  { %151 = vsyncadd [#allocation5], 4294966272  ;;  %v39_v0 = vld [vmem:[#allocation2] sm:$0x3f]  ;;  %v40_v1 = vld [vmem:[#allocation2 + $0x8] sm:$0x3f] }
   0xb   :  { %v41_v2 = vld [vmem:[#allocation2 + $0x10] sm:$0x3f]  ;;  %v42_v3 = vld [vmem:[#allocation2 + $0x18] sm:$0x3f]  ;;  %v43_v4 = vld [vmem:[#allocation2 + $0x20] sm:$0x3f] }
   0xc   :  { %v44_v5 = vld [vmem:[#allocation2 + $0x28] sm:$0x3f]  ;;  %v47_v6 = vld [vmem:[#allocation4] sm:$0x3f]  ;;  %v49_v8 = vld [vmem:[#allocation4 + $0x10] sm:$0x3f] }
   0xd   :  { %v48_v7 = vld [vmem:[#allocation4 + $0x8] sm:$0x3f]  ;;  %v50_v9 = vld [vmem:[#allocation4 + $0x18] sm:$0x3f]  ;;  %v55_v10 = vsub.f32 %v39_v0, %v47_v6  ;;  %v51_v11 = vld [vmem:[#allocation4 + $0x20] sm:$0x3f]  ;;  %v57_v14 = vsub.f32 %v41_v2, %v49_v8 }
   0xe   :  { %v52_v12 = vld [vmem:[#allocation4 + $0x28] sm:$0x3f]  ;;  %v56_v13 = vsub.f32 %v40_v1, %v48_v7  ;;  %v58_v15 = vsub.f32 %v42_v3, %v50_v9  ;;  %vm71_vm0 = vcmask 1045504   ;;  %v45_v16 = vld [vmem:[#allocation2 + $0x30] sm:$0x3f]  ;;  %v59_v18 = vsub.f32 %v43_v4, %v51_v11 }
   0xf   :  { %v53_v17 = vld [vmem:[#allocation4 + $0x30] sm:$0x3f]  ;;  %v63_v19 = vmul.f32 %v55_v10, %v55_v10  ;;  %v60_v20 = vsub.f32 %v44_v5, %v52_v12  ;;  %v65_v22 = vmul.f32 %v57_v14, %v57_v14  ;;  %v46_v24 = vld [vmem:[#allocation2 + $0x38] sm:$0x3f]  ;;  %vm90_vm1 = vcmask 5120  }
  0x10   :  { %v64_v21 = vmul.f32 %v56_v13, %v56_v13  ;;  %v66_v23 = vmul.f32 %v58_v15, %v58_v15  ;;  %v54_v25 = vld [vmem:[#allocation4 + $0x38] sm:$0x3f]  ;;  %v61_v27 = vsub.f32 %v45_v16, %v53_v17  ;;  %v67_v28 = vmul.f32 %v59_v18, %v59_v18 }
  0x11   :  { %v72_v26 = vsel %vm71_vm0, %v63_v19, 0.0  ;;  %v75_v30 = vsel %vm71_vm0, %v65_v22, 0.0  ;;  %v62_v32 = vsub.f32 %v46_v24, %v54_v25  ;;  %v68_v33 = vmul.f32 %v60_v20, %v60_v20 }
  0x12   :  { %v73_v29 = vsel %vm71_vm0, %v64_v21, 0.0  ;;  %v77_v34 = vsel %vm71_vm0, %v66_v23, 0.0  ;;  %v69_v36 = vmul.f32 %v61_v27, %v61_v27  ;;  %v79_v37 = vsel %vm71_vm0, %v67_v28, 0.0 }
  0x13   :  { %v74_v31 = vadd.f32 %v73_v29, %v72_v26  ;;  %v70_v39 = vmul.f32 %v62_v32, %v62_v32  ;;  %v81_v40 = vsel %vm71_vm0, %v68_v33, 0.0 }
  0x14   :  { %v83_v42 = vsel %vm71_vm0, %v69_v36, 0.0 }
  0x15   :  { %v76_v35 = vadd.f32 %v75_v30, %v74_v31  ;;  %v85_v44 = vsel %vm71_vm0, %v70_v39, 0.0 }
  0x17   :  { %v78_v38 = vadd.f32 %v77_v34, %v76_v35 }
  0x19   :  { %v80_v41 = vadd.f32 %v79_v37, %v78_v38 }
  0x1b   :  { %v82_v43 = vadd.f32 %v81_v40, %v80_v41 }
  0x1d   :  { %v84_v45 = vadd.f32 %v83_v42, %v82_v43 }
  0x1f   :  { %v86_v46 = vadd.f32 %v85_v44, %v84_v45 }
  0x21   :  { %87 = vadd.xlane.f32.xlu0 %v86_v46 }
  0x94   :  { %v88_v47 = vpop.xlane.xlu0 %87 }
  0x95   :  { %v89_v48 = vmul.f32 0.0009765625, %v88_v47 }
  0x97   :  { %91 = vst.msk [vmem:[%s188_s2] sm:$0x3f] %vm90_vm1, %v89_v48 }
  0x98   :  { %96 = vsyncpa [#allocation3], 1 }
  0x99   :  { %97 = vsyncpa [#allocation5], 1 }

</bundles_post_ra>
